<compile_context>
chip_gen: v7x
topology: tpu7x:2x2x1
jax: 0.10.0
libtpu: 0.0.40
codegen_flags: <defaults>
</compile_context>

<pallas_src>
import functools

import jax
import jax.numpy as jnp
import numpy as np
from jax.experimental import pallas as pl
from jax.experimental.pallas import tpu as pltpu

LANES = 128
SUBLANES = 8


def _alpine_n1_kernel(x_ref, o_ref, *, bounds):
    """x_ref: (block_rows, 128) f32 tile; o_ref: (1, 8, 128) f32 resident accumulator."""
    # o_ref is resident across the inner ("arbitrary") grid axis; one tile per
    # parallel shard.  Zero it on the first inner step.
    @pl.when(pl.program_id(1) == 0)
    def _():
        o_ref[...] = jnp.zeros_like(o_ref)

    x = x_ref[...]  # (block_rows, 128) f32

    # Periodic boundary conditions (static decision: `bounds` is a Python value).
    # Matches torch's two *sequential* masked in-place updates exactly: the
    # second mask is evaluated on the already-updated tensor.  True division by
    # `bounds` (not a precomputed reciprocal) so floor/ceil round identically to
    # the PyTorch reference at half-period boundaries.  PBC(0) == 0, so the
    # zero-padded tail stays zero.
    if bounds is not None:
        b = jnp.float32(bounds)
        x1 = jnp.where(x >= 0, x - b * jnp.floor(x / b + 0.5), x)
        x = jnp.where(x1 < 0, x1 - b * jnp.ceil(x1 / b - 0.5), x1)

    # Alpine N.1: |x * (sin(x) + 0.1)|  (== |x*sin(x) + 0.1*x|, one fewer vmul).
    z = jnp.abs(x * (jnp.sin(x) + 0.1))

    # Block reduction with pure vreg adds (no XLU lane movement, no masked
    # scalar store): (block_rows, 128) -> (block_rows/8, 8, 128) is a
    # layout-free regrouping of sublane rows; summing axis 0 adds whole vregs.
    block_rows = x_ref.shape[0]
    partial = z.reshape(block_rows // SUBLANES, SUBLANES, LANES).sum(axis=0)  # (8, 128)
    o_ref[...] += partial[None, :, :]


def alpine_n1_forward(x, bounds=None, *, max_block_rows=4096, num_splits=2):
    """x: any-shape f32 array of positions (the module's `weights` / X).
    Returns a 0-d f32 scalar, matching torch.sum in the module's forward.

    max_block_rows=4096 -> 2 MiB f32 blocks (safe & near-roofline on all
    generations); bump toward 8192 on v7x if desired.  num_splits=2 shards the
    grid across both v7x TensorCores via the "parallel" leading axis.
    """
    x = jnp.asarray(x, jnp.float32).reshape(-1)
    n = x.shape[0]

    # Lane-dense layout: ceil to whole (8, 128) vreg rows.
    rows = max(1, -(-n // LANES))                       # cdiv(n, 128)
    rows8 = -(-rows // SUBLANES) * SUBLANES             # round up to sublane multiple

    block_rows = max(SUBLANES, min((max_block_rows // SUBLANES) * SUBLANES, rows8))
    num_blocks = -(-rows8 // block_rows)                # cdiv
    splits = max(1, min(int(num_splits), num_blocks))
    blocks_per_split = -(-num_blocks // splits)         # cdiv
    total_rows = splits * blocks_per_split * block_rows
    total_elems = total_rows * LANES

    # Minimal tail padding with zeros (zeros are PBC fixed points and add 0 to
    # the sum).  When the input is already block-aligned this is a free reshape
    # (no HBM copy).
    if n == total_elems:
        x2d = x.reshape(total_rows, LANES)
    else:
        x2d = jnp.pad(x, (0, total_elems - n)).reshape(total_rows, LANES)

    kernel = functools.partial(
        _alpine_n1_kernel,
        bounds=None if bounds is None else float(bounds),
    )

    bps = blocks_per_split  # static closure constant for the index maps

    partials = pl.pallas_call(
        kernel,
        out_shape=jax.ShapeDtypeStruct((splits, SUBLANES, LANES), jnp.float32),
        grid_spec=pltpu.PrefetchScalarGridSpec(
            num_scalar_prefetch=0,
            grid=(splits, blocks_per_split),
            in_specs=[
                pl.BlockSpec(
                    (block_rows, LANES), lambda s, i: (s * bps + i, 0)
                )
            ],
            out_specs=pl.BlockSpec(
                (1, SUBLANES, LANES), lambda s, i: (s, 0, 0)
            ),
        ),
        compiler_params=pltpu.CompilerParams(
            # Leading axis: independent per-shard accumulators -> megacore
            # parallel on v7x.  Trailing axis: reduction into the resident tile.
            dimension_semantics=("parallel", "arbitrary"),
        ),
    )(x2d)

    # Final tiny reduce (splits x 8 x 128 f32) outside the hot loop.
    return jnp.sum(partials)


def _reference(x, bounds=None):
    """Pure-JAX reference mirroring the torch forward (incl. sequential PBC)."""
    x = jnp.asarray(x, jnp.float32)
    if bounds is not None:
        b = jnp.float32(bounds)
        x1 = jnp.where(x >= 0, x - b * jnp.floor(x / b + 0.5), x)
        x = jnp.where(x1 < 0, x1 - b * jnp.ceil(x1 / b - 0.5), x1)
    return jnp.sum(jnp.abs(x * jnp.sin(x) + 0.1 * x))


if __name__ == "__main__":
    key = jax.random.PRNGKey(0)
    k1, k2 = jax.random.split(key)

    # `start` plays the role of the nn.Parameter `weights` (X defaults to it).
    dim = 32
    start = jax.random.uniform(k1, (dim,), jnp.float32, minval=-4.0, maxval=4.0)
    bounds = 5.0

    # 1) PBC path.
    z = alpine_n1_forward(start, bounds=bounds)
    jax.block_until_ready(z)
    np.testing.assert_allclose(
        np.asarray(z), np.asarray(_reference(start, bounds)), rtol=1e-5, atol=1e-4
    )

    # 2) No-PBC path (bounds=None).
    z2 = alpine_n1_forward(start, bounds=None)
    jax.block_until_ready(z2)
    np.testing.assert_allclose(
        np.asarray(z2), np.asarray(_reference(start, None)), rtol=1e-5, atol=1e-4
    )

    # 3) Batched-positions path exercising the multi-block accumulator and the
    #    2-way "parallel" split (small block_rows forces several grid steps).
    xb = jax.random.uniform(k2, (4096,), jnp.float32, minval=-8.0, maxval=8.0)
    z3 = alpine_n1_forward(xb, bounds=bounds, max_block_rows=8, num_splits=2)
    jax.block_until_ready(z3)
    np.testing.assert_allclose(
        np.asarray(z3), np.asarray(_reference(xb, bounds)), rtol=1e-5, atol=1e-2
    )

    print("KERNEL_OK")
</pallas_src>

<mosaic_0001>
module attributes {stable_mosaic.version = 11 : i64} {
  func.func @_alpine_n1_kernel(%arg0: i32, %arg1: i32, %arg2: memref<8x128xf32, #tpu.memory_space<vmem>>, %arg3: memref<1x8x128xf32, #tpu.memory_space<vmem>>) attributes {dimension_semantics = [#tpu.dimension_semantics<parallel>, #tpu.dimension_semantics<arbitrary>], iteration_bounds = array<i64: 1, 1>, scalar_prefetch = 0 : i64, scratch_operands = 0 : i64, tpu.core_type = #tpu.core_type<tc>, window_params = [{transform_indices = @transform_0, window_bounds = array<i64: 8, 128>}, {transform_indices = @transform_1, window_bounds = array<i64: 1, 8, 128>}]} {
    %c0_i32 = arith.constant 0 : i32
    %0 = arith.cmpi eq, %arg1, %c0_i32 : i32
    %1 = arith.extui %0 : i1 to i32
    %c0_i32_0 = arith.constant 0 : i32
    %2 = arith.cmpi ne, %1, %c0_i32_0 : i32
    scf.if %2 {
      %cst_17 = arith.constant 0.000000e+00 : f32
      %37 = vector.broadcast %cst_17 : f32 to vector<1x8x128xf32>
      %c0_18 = arith.constant 0 : index
      %c0_19 = arith.constant 0 : index
      %c0_20 = arith.constant 0 : index
      %38 = vector.load %arg3[%c0_18, %c0_19, %c0_20] : memref<1x8x128xf32, #tpu.memory_space<vmem>>, vector<1x8x128xf32>
      tpu.vector_store %arg3[%c0_18, %c0_19, %c0_20], %37 {strides = array<i32>} : memref<1x8x128xf32, #tpu.memory_space<vmem>>, vector<1x8x128xf32>,
    } else {
    }
    %c0 = arith.constant 0 : index
    %c0_1 = arith.constant 0 : index
    %3 = vector.load %arg2[%c0, %c0_1] : memref<8x128xf32, #tpu.memory_space<vmem>>, vector<8x128xf32>
    %cst = arith.constant 0.000000e+00 : f32
    %4 = vector.broadcast %cst : f32 to vector<8x128xf32>
    %5 = arith.cmpf oge, %3, %4 : vector<8x128xf32>
    %cst_2 = arith.constant 5.000000e+00 : f32
    %6 = vector.broadcast %cst_2 : f32 to vector<8x128xf32>
    %7 = arith.divf %3, %6 : vector<8x128xf32>
    %cst_3 = arith.constant 5.000000e-01 : f32
    %8 = vector.broadcast %cst_3 : f32 to vector<8x128xf32>
    %9 = arith.addf %7, %8 : vector<8x128xf32>
    %10 = math.floor %9 : vector<8x128xf32>
    %cst_4 = arith.constant 5.000000e+00 : f32
    %11 = vector.broadcast %cst_4 : f32 to vector<8x128xf32>
    %12 = arith.mulf %11, %10 : vector<8x128xf32>
    %13 = arith.subf %3, %12 : vector<8x128xf32>
    %14 = arith.select %5, %13, %3 : vector<8x128xi1>, vector<8x128xf32>
    %cst_5 = arith.constant 0.000000e+00 : f32
    %15 = vector.broadcast %cst_5 : f32 to vector<8x128xf32>
    %16 = arith.cmpf olt, %14, %15 : vector<8x128xf32>
    %cst_6 = arith.constant 5.000000e+00 : f32
    %17 = vector.broadcast %cst_6 : f32 to vector<8x128xf32>
    %18 = arith.divf %14, %17 : vector<8x128xf32>
    %cst_7 = arith.constant 5.000000e-01 : f32
    %19 = vector.broadcast %cst_7 : f32 to vector<8x128xf32>
    %20 = arith.subf %18, %19 : vector<8x128xf32>
    %21 = math.ceil %20 : vector<8x128xf32>
    %cst_8 = arith.constant 5.000000e+00 : f32
    %22 = vector.broadcast %cst_8 : f32 to vector<8x128xf32>
    %23 = arith.mulf %22, %21 : vector<8x128xf32>
    %24 = arith.subf %14, %23 : vector<8x128xf32>
    %25 = arith.select %16, %24, %14 : vector<8x128xi1>, vector<8x128xf32>
    %26 = math.sin %25 : vector<8x128xf32>
    %cst_9 = arith.constant 1.000000e-01 : f32
    %27 = vector.broadcast %cst_9 : f32 to vector<8x128xf32>
    %28 = arith.addf %26, %27 : vector<8x128xf32>
    %29 = arith.mulf %25, %28 : vector<8x128xf32>
    %30 = math.absf %29 : vector<8x128xf32>
    %31 = vector.shape_cast %30 : vector<8x128xf32> to vector<1x8x128xf32>
    %cst_10 = arith.constant dense<0.000000e+00> : vector<8x128xf32>
    %32 = vector.multi_reduction <add>, %31, %cst_10 [0] : vector<1x8x128xf32> to vector<8x128xf32>
    %c0_11 = arith.constant 0 : index
    %c0_12 = arith.constant 0 : index
    %c0_13 = arith.constant 0 : index
    %33 = vector.load %arg3[%c0_11, %c0_12, %c0_13] : memref<1x8x128xf32, #tpu.memory_space<vmem>>, vector<1x8x128xf32>
    %34 = vector.shape_cast %32 : vector<8x128xf32> to vector<1x8x128xf32>
    %35 = arith.addf %33, %34 : vector<1x8x128xf32>
    %c0_14 = arith.constant 0 : index
    %c0_15 = arith.constant 0 : index
    %c0_16 = arith.constant 0 : index
    %36 = vector.load %arg3[%c0_14, %c0_15, %c0_16] : memref<1x8x128xf32, #tpu.memory_space<vmem>>, vector<1x8x128xf32>
    tpu.vector_store %arg3[%c0_14, %c0_15, %c0_16], %35 {strides = array<i32>} : memref<1x8x128xf32, #tpu.memory_space<vmem>>, vector<1x8x128xf32>,
    return
  }
  func.func @transform_0(%arg0: i32, %arg1: i32) -> (i32, i32) {
    %c1_i32 = arith.constant 1 : i32
    %0 = arith.muli %arg0, %c1_i32 : i32
    %1 = arith.addi %0, %arg1 : i32
    %c0_i32 = arith.constant 0 : i32
    %c0_i32_0 = arith.constant 0 : i32
    return %1, %c0_i32 : i32, i32
  }
  func.func @transform_1(%arg0: i32, %arg1: i32) -> (i32, i32, i32) {
    %c0_i32 = arith.constant 0 : i32
    %c0_i32_0 = arith.constant 0 : i32
    %c0_i32_1 = arith.constant 0 : i32
    return %arg0, %c0_i32, %c0_i32_0 : i32, i32, i32
  }
}

</mosaic_0001>

<bundles_post_ra>
// kernel: tpu_custom_call.1
= control target key start
LH: loop header
LB: loop body
LE: loop exit
PB: predicated region body
PF: predicated region fallthrough
CT: control target
= control target key end

     0   :  { %6 = vsyncpa [#allocation3], 0  ;;  %s306_s0 = inlined_call_operand.hbm [shape: f32[8,128], index: 0, kind: input, shape index: {}]   ;;  %s307_s1 = inlined_call_operand.hbm [shape: f32[1,8,128], index: 1, kind: output, shape index: {}]  }
   0x1   :  { %7 = vsyncpa [#allocation4], 0  ;;  %s242_s6 = smov [#allocation2]   ;;  %s194_s10 = scalar_lea.hbm %s306_s0, 128 }
   0x2   :  { %s17_s7 = sshll.u32 %s242_s6, 4  ;;  %p195_p0 = scmp.ne.s32.totalorder %s306_s0, %s194_s10  ;;  %s18_s7 = int_to_ptr.vmem [resolvable:$true] %s17_s7 }
   0x3   :  { %p198_p1 = scmp.lt.u32.totalorder %s194_s10, %s306_s0 }
   0x5   :  { %p200_p2 = pnand %p198_p1, %p195_p0 }
   0x7   :  { %203 = shalt.err (!%p200_p2)
}
   0x8   :  { %s204_s15 = scalar_lea.vmem %s18_s7, 128  ;;  %p209_p4 = scmp.lt.s32.totalorder %s18_s7, %s18_s7 }
   0x9   :  { %p205_p3 = scmp.ne.s32.totalorder %s18_s7, %s204_s15  ;;  %p210_p5 = scmp.lt.s32.totalorder %s204_s15, %s204_s15 }
   0xb   :  { %p211_p6 = por %p210_p5, %p209_p4 }
   0xd   :  { %p212_p7 = pnand %p211_p6, %p205_p3 }
   0xf   :  { %215 = shalt.err (!%p212_p7)
}
  0x10   :  { %20 = dma.hbm_to_vmem [thread:$0]  %s306_s0, 128, %s18_s7, [#allocation3]  }
  0x11   :  { %238 = dma.done.wait [#allocation3], 128  }
  0x12   :  { %239 = vsyncadd [#allocation3], 4294967168  ;;  %v30_v0 = vld [vmem:[#allocation2] sm:$0xff]  ;;  %v243_v24 = vmov 683565275   ;;  %s249_s0 = smov [#allocation5]  }
  0x13   :  { %v33_v1 = vmul.f32 0.2, %v30_v0  ;;  %vm31_vm0 = vcmp.ge.f32.partialorder %v30_v0, 0.0  ;;  %v244_v26 = vmov 2475754826   ;;  %s163_s18 = sshll.u32 %s249_s0, 4  ;;  %s164_s18 = int_to_ptr.vmem [resolvable:$true] %s163_s18 }
  0x14   :  { %v245_v28 = vmov 2131351028   ;;  %v246_v30 = vmov 2102212464   ;;  %v247_v32 = vmov 920167782   ;;  %p221_p9 = scmp.lt.s32.totalorder %s164_s18, %s164_s18 }
  0x15   :  { %v34_v2 = vadd.f32 0.5, %v33_v1  ;;  %v248_v39 = vmov 1326507024   ;;  %s216_s19 = scalar_lea.vmem %s164_s18, 128 }
  0x16   :  { %p217_p8 = scmp.ne.s32.totalorder %s164_s18, %s216_s19  ;;  %p222_p10 = scmp.lt.s32.totalorder %s216_s19, %s216_s19 }
  0x17   :  { %v35_v3 = vfloor.f32 %v34_v2 }
  0x18   :  { %p223_p11 = por %p222_p10, %p221_p9 }
  0x19   :  { %v36_v4 = vmul.f32 5.0, %v35_v3 }
  0x1a   :  { %p224_p12 = pnand %p223_p11, %p217_p8 }
  0x1b   :  { %v37_v5 = vsub.f32 %v30_v0, %v36_v4 }
  0x1d   :  { %v38_v6 = vsel %vm31_vm0, %v37_v5, %v30_v0 }
  0x1e   :  { %v40_v7 = vmul.f32 0.2, %v38_v6  ;;  %vm39_vm1 = vcmp.lt.f32.partialorder %v38_v6, 0.0 }
  0x20   :  { %v172_v8 = vadd.f32 -0.5, %v40_v7 }
  0x22   :  { %v42_v9 = vceil.f32 %v172_v8 }
  0x24   :  { %v43_v10 = vmul.f32 5.0, %v42_v9 }
  0x26   :  { %v44_v11 = vsub.f32 %v38_v6, %v43_v10 }
  0x28   :  { %v272_v12 = vsel %vm39_vm1, %v44_v11, %v38_v6 }
  0x29   :  { %v49_v13 = vand.u32 2139095040, %v272_v12  ;;  %v46_v15 = vand.u32 2147483647, %v272_v12  ;;  %vm48_vm9 = vcmp.lt.s32.totalorder %v272_v12, 0  ;;  %vm138_vm14 = vweird.f32 %v272_v12 }
  0x2b   :  { %v50_v14 = vshrl.u32 %v49_v13, 23  ;;  %v53_v18 = vand.u32 8388607, %v46_v15  ;;  %vm47_vm10 = vcmp.le.f32.partialorder %v46_v15, 0.7853982 }
  0x2d   :  { %v173_v16 = vadd.s32 4294967169, %v50_v14  ;;  %v54_v21 = vor.u32 8388608, %v53_v18 }
  0x2f   :  { %v56_v17 = vadd.s32 1, %v173_v16  ;;  %v94_v41 = vshll.u32 %v54_v21, 8 }
  0x31   :  { %vm57_vm2 = vcmp.gt.s32.totalorder %v56_v17, 0 }
  0x32   :  { %v58_v19 = vsel %vm57_vm2, %v56_v17, 0 }
  0x33   :  { %v60_v20 = vand.u32 31, %v58_v19  ;;  %v59_v22 = vshrl.u32 %v58_v19, 5 }
  0x35   :  { %v61_v23 = vsub.s32 32, %v60_v20  ;;  %v63_v25 = vshll.u32 %v243_v24, %v60_v20  ;;  %v66_v27 = vshll.u32 %v244_v26, %v60_v20  ;;  %v69_v29 = vshll.u32 %v245_v28, %v60_v20 }
  0x36   :  { %v72_v31 = vshll.u32 %v246_v30, %v60_v20  ;;  %v75_v33 = vshll.u32 %v247_v32, %v60_v20  ;;  %vm78_vm3 = vcmp.lt.s32.totalorder %v59_v22, 1  ;;  %vm81_vm4 = vcmp.lt.s32.totalorder %v59_v22, 4 }
  0x37   :  { %v62_v34 = vshrl.u32 %v243_v24, %v61_v23  ;;  %v64_v35 = vshrl.u32 %v244_v26, %v61_v23  ;;  %v67_v36 = vshrl.u32 %v245_v28, %v61_v23  ;;  %v70_v37 = vshrl.u32 %v246_v30, %v61_v23 }
  0x38   :  { %v73_v38 = vshrl.u32 %v247_v32, %v61_v23  ;;  %v76_v40 = vshrl.u32 %v248_v39, %v61_v23  ;;  %vm79_vm5 = vcmp.lt.s32.totalorder %v59_v22, 2  ;;  %vm80_vm6 = vcmp.lt.s32.totalorder %v59_v22, 3 }
  0x39   :  { %v65_v42 = vor.u32 %v64_v35, %v63_v25  ;;  %v68_v43 = vor.u32 %v67_v36, %v66_v27  ;;  %v71_v44 = vor.u32 %v70_v37, %v69_v29 }
  0x3a   :  { %v74_v45 = vor.u32 %v73_v38, %v72_v31  ;;  %v77_v46 = vor.u32 %v76_v40, %v75_v33 }
  0x3b   :  { %v82_v47 = vsel %vm78_vm3, %v62_v34, %v65_v42  ;;  %v83_v48 = vsel %vm81_vm4, %v71_v44, 2102212464  ;;  %v86_v49 = vsel %vm78_vm3, %v65_v42, %v68_v43  ;;  %v90_v50 = vsel %vm78_vm3, %v68_v43, %v71_v44 }
  0x3c   :  { %v84_v51 = vsel %vm80_vm6, %v68_v43, %v83_v48  ;;  %v87_v52 = vsel %vm81_vm4, %v74_v45, 920167782  ;;  %v91_v53 = vsel %vm81_vm4, %v77_v46, 1326507024 }
  0x3d   :  { %v88_v54 = vsel %vm80_vm6, %v71_v44, %v87_v52  ;;  %v92_v55 = vsel %vm80_vm6, %v74_v45, %v91_v53  ;;  %v85_v56 = vsel %vm79_vm5, %v82_v47, %v84_v51 }
  0x3e   :  { %v89_v57 = vsel %vm79_vm5, %v86_v49, %v88_v54  ;;  %v93_v58 = vsel %vm79_vm5, %v90_v50, %v92_v55  ;;  %v101_v63 = vmul.u32 %v94_v41, %v85_v56 }
  0x3f   :  { %v278_v59 = vmul.u32.u64.low %v94_v41, %v93_v58  ;;  %v279_v60 = vmul.u32.u64.high %v94_v41, %v93_v58, %v278_v59  ;;  %v281_v61 = vmul.u32.u64.low %v94_v41, %v89_v57  ;;  %v282_v62 = vmul.u32.u64.high %v94_v41, %v89_v57, %v281_v61 }
  0x41   :  { %vm103_vm7 = vc.u32 %v279_v60, %v281_v61  ;;  %v104_v0 = vadd.s32 1, %v282_v62  ;;  %v102_v11 = vadd.s32 %v281_v61, %v279_v60 }
  0x43   :  { %v105_v1 = vsel %vm103_vm7, %v104_v0, %v282_v62 }
  0x44   :  { %v106_v2 = vadd.s32 %v105_v1, %v101_v63 }
  0x46   :  { %v107_v3 = vadd.s32 536870912, %v106_v2 }
  0x48   :  { %v108_v4 = vshrl.u32 %v107_v3, 30 }
  0x4a   :  { %v109_v5 = vshll.u32 %v108_v4, 30  ;;  %v132_v25 = vsub.s32 4, %v108_v4 }
  0x4c   :  { %v110_v6 = vsub.s32 %v106_v2, %v109_v5  ;;  %v133_v28 = vsel %vm48_vm9, %v132_v25, %v108_v4 }
  0x4d   :  { %v135_v31 = vsel %vm47_vm10, 0, %v133_v28 }
  0x4e   :  { %v112_v7 = vsub.s32 0, %v110_v6  ;;  %v139_v32 = vadd.s32 3, %v135_v31 }
  0x50   :  { %v174_v8 = vmin.u32 %v112_v7, %v110_v6  ;;  %v140_v33 = vand.u32 3, %v139_v32 }
  0x52   :  { %v114_v9 = vclz %v174_v8  ;;  %vm145_vm11 = vcmp.eq.s32.totalorder %v140_v33, 2  ;;  %vm142_vm12 = vcmp.eq.s32.totalorder %v140_v33, 0  ;;  %vm141_vm13 = vcmp.lt.s32.totalorder %v140_v33, 2 }
  0x54   :  { %v175_v10 = vadd.s32 4294967294, %v114_v9 }
  0x56   :  { %vm176_vm8 = vcmp.lt.s32.totalorder %v175_v10, 0 }
  0x57   :  { %v117_v13 = vsel %vm176_vm8, 0, %v175_v10 }
  0x58   :  { %v118_v14 = vsub.s32 32, %v117_v13  ;;  %v119_v16 = vshll.u32 %v110_v6, %v117_v13  ;;  %v122_v17 = vsub.s32 4294967266, %v117_v13 }
  0x5a   :  { %v120_v18 = vshrl.u32 %v102_v11, %v118_v14  ;;  %v123_v19 = vadd.s32 127, %v122_v17 }
  0x5c   :  { %v121_v20 = vor.u32 %v120_v18, %v119_v16  ;;  %v124_v21 = vshll.u32 %v123_v19, 23 }
  0x5e   :  { %v125_v22 = vor.u32 4788187, %v124_v21  ;;  %v128_v23 = vcvt.s32.f32 %v121_v20 }
  0x60   :  { %v126_v24 = vand.u32 2147483647, %v125_v22 }
  0x62   :  { %v129_v26 = vmul.f32 %v128_v23, %v126_v24 }
  0x64   :  { %v130_v27 = vxor.u32 2147483648, %v129_v26 }
  0x66   :  { %v131_v29 = vsel %vm48_vm9, %v130_v27, %v129_v26 }
  0x67   :  { %v134_v30 = vsel %vm47_vm10, %v272_v12, %v131_v29 }
  0x68   :  { %190 = vcosq.f32 %v134_v30 }
  0x69   :  { %192 = vsinq.f32 %v134_v30 }
  0x72   :  { %v191_v34 = vpop.eup %190 }
  0x73   :  { %v193_v35 = vpop.eup %192  ;;  %v146_v36 = vxor.u32 2147483648, %v191_v34 }
  0x74   :  { %v143_v37 = vxor.u32 2147483648, %v193_v35 }
  0x75   :  { %v147_v15 = vsel %vm145_vm11, %v146_v36, %v193_v35 }
  0x76   :  { %v144_v38 = vsel %vm142_vm12, %v191_v34, %v143_v37 }
  0x77   :  { %v148_v39 = vsel %vm141_vm13, %v144_v38, %v147_v15 }
  0x78   :  { %v149_v40 = vsel %vm138_vm14, nan, %v148_v39 }
  0x79   :  { %v150_v41 = vadd.f32 0.1, %v149_v40 }
  0x7b   :  { %v151_v42 = vmul.f32 %v150_v41, %v272_v12 }
  0x7d   :  { %v152_v43 = vand.u32 2147483647, %v151_v42 }
  0x7f   :  { %156 = vst [vmem:[#allocation5] sm:$0xff] %v152_v43 }
  0x80   :  { %227 = shalt.err (!%p224_p12)
}
  0x81   :  { %s228_s22 = scalar_lea.hbm %s307_s1, 128 }
  0x82   :  { %p229_p13 = scmp.ne.s32.totalorder %s307_s1, %s228_s22  ;;  %p232_p0 = scmp.lt.u32.totalorder %s228_s22, %s307_s1 }
  0x84   :  { %p234_p1 = pnand %p232_p0, %p229_p13 }
  0x86   :  { %237 = shalt.err (!%p234_p1)
}
  0x87   :  { %166 = dma.vmem_to_hbm [thread:$0]  %s164_s18, 128, %s307_s1, [#allocation4]  }
  0x88   :  { %240 = dma.done.wait [#allocation4], 128  }
  0x89   :  { %241 = vsyncadd [#allocation4], 4294967168 }
  0x8a   :  { %170 = vsyncpa [#allocation3], 1 }
  0x8b   :  { %171 = vsyncpa [#allocation4], 1 }

</bundles_post_ra>
